<compile_context>
chip_gen: v7x
topology: tpu7x:2x2x1
jax: 0.10.0
libtpu: 0.0.40
codegen_flags: <defaults>
</compile_context>

<pallas_src>
import functools

import jax
import jax.numpy as jnp
from jax import lax
from jax.experimental import pallas as pl
from jax.experimental.pallas import tpu as pltpu


# ---------------------------------------------------------------------------
# Small helpers
# ---------------------------------------------------------------------------
def _round_up(x, m):
    return (x + m - 1) // m * m


def _vmem_limit(block_bytes, headroom=4 << 20, floor=8 << 20, cap=48 << 20):
    # x2: Pallas double-buffers every auto-pipelined block.  Clamp to 48 MiB so
    # the same config ports to v7x (64 MiB physical VMEM) without surprises.
    need = 2 * int(block_bytes) + headroom
    return int(min(max(need, floor), cap))


def _pick_row_tile(M, target=512):
    """Row tile for kernel 1: big (HBM-roofline / MXU-fill) but >=2 grid steps."""
    if M <= 16:
        return _round_up(M, 8)
    return min(target, _round_up((M + 1) // 2, 8))


def _pick_seq_tile(S, target=256):
    """S tile for kernel 2: bounds VMEM at real S, >=2 reduction steps."""
    if S <= 8:
        return S
    return min(target, _round_up((S + 1) // 2, 8))


# ---------------------------------------------------------------------------
# Kernel 1: dual-backbone conv (block-diag matmul) + encoder fusion + k/v proj
# ---------------------------------------------------------------------------
def _backbone_encoder_kv_kernel(p_ref, wbb_ref, bbb_ref, wenc_ref, benc_ref,
                                wk_ref, bk_ref, wv_ref, bv_ref, k_ref, v_ref):
    # Both backbone convs as ONE matmul (bf16 operands, f32 accumulate on MXU).
    fused = jnp.dot(p_ref[...], wbb_ref[...], preferred_element_type=jnp.float32)
    fused = jnp.maximum(fused + bbb_ref[...], 0.0)                      # ReLU
    # Encoder channel-fusion 1x1 conv chained in VMEM (no HBM round trip).
    mem = jnp.dot(fused.astype(jnp.bfloat16), wenc_ref[...],
                  preferred_element_type=jnp.float32)
    mem = jnp.maximum(mem + benc_ref[...], 0.0).astype(jnp.bfloat16)    # ReLU
    # Decoder k / v projections fused at the large row tile: much better MXU
    # fill than per-batch (S, D) steps and saves one full HBM pass over memory.
    k = jnp.dot(mem, wk_ref[...], preferred_element_type=jnp.float32) + bk_ref[...]
    v = jnp.dot(mem, wv_ref[...], preferred_element_type=jnp.float32) + bv_ref[...]
    k_ref[...] = k.astype(k_ref.dtype)
    v_ref[...] = v.astype(v_ref.dtype)


def backbone_encoder_kv(patches, wbb, bbb, wenc, benc, wk, bk, wv, bv, *, tm):
    """patches (Mp, Kp) -> K, V slabs (Mp, Dp) bf16; grid over row tiles."""
    Mp, Kp = patches.shape
    C2p = wbb.shape[1]
    Dp = wenc.shape[1]
    block_bytes = (tm * Kp * 2 + Kp * C2p * 2 + C2p * 4 + C2p * Dp * 2 + Dp * 4
                   + 2 * Dp * Dp * 2 + 2 * Dp * 4 + 2 * tm * Dp * 2)
    return pl.pallas_call(
        _backbone_encoder_kv_kernel,
        out_shape=(jax.ShapeDtypeStruct((Mp, Dp), jnp.bfloat16),
                   jax.ShapeDtypeStruct((Mp, Dp), jnp.bfloat16)),
        grid=(Mp // tm,),
        in_specs=[
            pl.BlockSpec((tm, Kp), lambda i: (i, 0)),   # im2col patches (row tile)
            pl.BlockSpec((Kp, C2p), lambda i: (0, 0)),  # block-diag backbone weight
            pl.BlockSpec((1, C2p), lambda i: (0, 0)),   # backbone biases
            pl.BlockSpec((C2p, Dp), lambda i: (0, 0)),  # encoder 1x1 weight
            pl.BlockSpec((1, Dp), lambda i: (0, 0)),    # encoder bias
            pl.BlockSpec((Dp, Dp), lambda i: (0, 0)),   # k projection
            pl.BlockSpec((1, Dp), lambda i: (0, 0)),
            pl.BlockSpec((Dp, Dp), lambda i: (0, 0)),   # v projection
            pl.BlockSpec((1, Dp), lambda i: (0, 0)),
        ],
        out_specs=(pl.BlockSpec((tm, Dp), lambda i: (i, 0)),
                   pl.BlockSpec((tm, Dp), lambda i: (i, 0))),
        compiler_params=pltpu.CompilerParams(
            dimension_semantics=("parallel",),
            vmem_limit_bytes=_vmem_limit(block_bytes)),
    )(patches, wbb, bbb, wenc, benc, wk, bk, wv, bv)


# ---------------------------------------------------------------------------
# Kernel 1b: batch-invariant q projection (attention scale folded into wq/bq)
# ---------------------------------------------------------------------------
def _q_proj_kernel(qe_ref, wq_ref, bq_ref, q_ref):
    q = jnp.dot(qe_ref[...], wq_ref[...], preferred_element_type=jnp.float32)
    q_ref[...] = (q + bq_ref[...]).astype(q_ref.dtype)


def q_projection(qe, wq, bq):
    Nqp, Dp = qe.shape
    return pl.pallas_call(
        _q_proj_kernel,
        out_shape=jax.ShapeDtypeStruct((Nqp, Dp), jnp.bfloat16),
        grid=(1,),
        in_specs=[pl.BlockSpec((Nqp, Dp), lambda i: (0, 0)),
                  pl.BlockSpec((Dp, Dp), lambda i: (0, 0)),
                  pl.BlockSpec((1, Dp), lambda i: (0, 0))],
        out_specs=pl.BlockSpec((Nqp, Dp), lambda i: (0, 0)),
    )(qe, wq, bq)


# ---------------------------------------------------------------------------
# Kernel 2: S-tiled cross attention (online softmax) + fused class/box heads
# ---------------------------------------------------------------------------
def _decoder_attn_heads_kernel(q_ref, k_ref, v_ref, wh_ref, bh_ref, mask_ref,
                               out_ref, m_sc, l_sc, acc_sc, *,
                               seq_valid, seq_tile, padded):
    s_idx = pl.program_id(1)

    @pl.when(s_idx == 0)
    def _():
        m_sc[...] = jnp.full_like(m_sc, -jnp.inf)
        l_sc[...] = jnp.zeros_like(l_sc)
        acc_sc[...] = jnp.zeros_like(acc_sc)

    q = q_ref[...]                          # (Nqp, Dp) bf16, scale pre-folded
    k = k_ref[0]                            # (ts, Dp)  bf16
    v = v_ref[0]                            # (ts, Dp)  bf16

    # Scores by contracting the last axes of q and k (no k.T materialized).
    s = lax.dot_general(q, k, (((1,), (1,)), ((), ())),
                        preferred_element_type=jnp.float32)         # (Nqp, ts)
    if padded:  # static: only emitted when S was padded up to the tile multiple
        col = s_idx * seq_tile + lax.broadcasted_iota(jnp.int32, s.shape, 1)
        s = jnp.where(col < seq_valid, s, -jnp.inf)

    # Online-softmax accumulation across the S ("arbitrary") grid axis.
    m_new = jnp.maximum(m_sc[...], jnp.max(s, axis=-1, keepdims=True))
    alpha = jnp.exp(m_sc[...] - m_new)
    p = jnp.exp(s - m_new)
    l_sc[...] = alpha * l_sc[...] + jnp.sum(p, axis=-1, keepdims=True)
    acc_sc[...] = alpha * acc_sc[...] + jnp.dot(
        p.astype(jnp.bfloat16), v, preferred_element_type=jnp.float32)
    m_sc[...] = m_new

    @pl.when(s_idx == pl.num_programs(1) - 1)
    def _():
        attn = acc_sc[...] * pl.reciprocal(l_sc[...], approx=True)
        # Fused class + box heads: one lane-dense (Nqp, 128) matmul; sigmoid
        # only on the box columns (mask is a precomputed input vector).
        h = jnp.dot(attn.astype(jnp.bfloat16), wh_ref[...],
                    preferred_element_type=jnp.float32) + bh_ref[...]
        out_ref[0] = jnp.where(mask_ref[...] > 0.5, jax.nn.sigmoid(h), h
                               ).astype(out_ref.dtype)


def decoder_attn_heads(q, k, v, wh, bh, box_mask):
    """q (Nqp, Dp), k/v (B, S, Dp) -> fused head slab (B, Nqp, 128)."""
    B, S, Dp = k.shape
    Nqp = q.shape[0]
    NH = wh.shape[1]
    ts = _pick_seq_tile(S)
    Sp = _round_up(S, ts)
    if Sp != S:
        pad = ((0, 0), (0, Sp - S), (0, 0))
        k = jnp.pad(k, pad)
        v = jnp.pad(v, pad)
    kernel = functools.partial(_decoder_attn_heads_kernel,
                               seq_valid=S, seq_tile=ts, padded=(Sp != S))
    block_bytes = (Nqp * Dp * 2 + 2 * ts * Dp * 2 + Dp * NH * 2 + 2 * NH * 4
                   + Nqp * NH * 4)
    scratch_bytes = Nqp * (Dp + 2) * 4
    return pl.pallas_call(
        kernel,
        out_shape=jax.ShapeDtypeStruct((B, Nqp, NH), jnp.float32),
        grid=(B, Sp // ts),
        in_specs=[
            pl.BlockSpec((Nqp, Dp), lambda b, s: (0, 0)),     # shared scaled q
            pl.BlockSpec((1, ts, Dp), lambda b, s: (b, s, 0)),  # K tile
            pl.BlockSpec((1, ts, Dp), lambda b, s: (b, s, 0)),  # V tile
            pl.BlockSpec((Dp, NH), lambda b, s: (0, 0)),      # fused cls|box head
            pl.BlockSpec((1, NH), lambda b, s: (0, 0)),
            pl.BlockSpec((1, NH), lambda b, s: (0, 0)),       # box-column mask
        ],
        out_specs=pl.BlockSpec((1, Nqp, NH), lambda b, s: (b, 0, 0)),
        scratch_shapes=[pltpu.VMEM((Nqp, 1), jnp.float32),
                        pltpu.VMEM((Nqp, 1), jnp.float32),
                        pltpu.VMEM((Nqp, Dp), jnp.float32)],
        compiler_params=pltpu.CompilerParams(
            dimension_semantics=("parallel", "arbitrary"),
            vmem_limit_bytes=_vmem_limit(block_bytes + scratch_bytes)),
    )(q, k, v, wh, bh, box_mask)


# ---------------------------------------------------------------------------
# Glue (im2col, weight packing/padding) — XLA side; all compute in the kernels
# ---------------------------------------------------------------------------
def _im2col_3x3_s2(x_nchw):
    x = jnp.transpose(x_nchw, (0, 2, 3, 1))     # NCHW -> NHWC
    B, H, W, C = x.shape
    stride = 2
    Ho = (H + 2 - 3) // stride + 1
    Wo = (W + 2 - 3) // stride + 1
    xp = jnp.pad(x, ((0, 0), (1, 1), (1, 1), (0, 0)))
    cols = []
    for kh in range(3):
        for kw in range(3):
            sl = xp[:, kh:kh + (Ho - 1) * stride + 1:stride,
                    kw:kw + (Wo - 1) * stride + 1:stride, :]
            cols.append(sl)
    patches = jnp.concatenate(cols, axis=-1)    # (B, Ho, Wo, 9*C), (kh,kw,c) order
    return patches.reshape(B * Ho * Wo, 9 * C), (B, Ho, Wo)


def _conv_w_to_mat(w_oihw):
    # (Cout, Cin, 3, 3) -> (9*Cin, Cout), matching the (kh, kw, c) patch order.
    cin = w_oihw.shape[1]
    return jnp.transpose(w_oihw, (2, 3, 1, 0)).reshape(9 * cin, w_oihw.shape[0])


def rtdetr_forward(params, x_rgb, x_ir):
    """Mirrors RTDETR.forward(x_rgb, x_ir, targets=None) in eval mode."""
    cf = params["bb_rgb_w"].shape[0]
    d_model = params["enc_w"].shape[1]
    n_classes = params["cls_w"].shape[1]
    n_queries = params["query_embed"].shape[0]
    NH = 128
    n_out = n_classes + 4
    assert n_out <= NH, "fused class|box head exceeds the 128-lane output slab"

    # --- im2col for both modalities, concatenated along the contraction dim ---
    p_rgb, (B, Ho, Wo) = _im2col_3x3_s2(x_rgb)          # (M, 9*Crgb)
    p_ir, _ = _im2col_3x3_s2(x_ir)                      # (M, 9*Cir)
    k_rgb, k_ir = p_rgb.shape[1], p_ir.shape[1]
    K = k_rgb + k_ir
    Kp = _round_up(K, 128)                              # lane-dense contraction
    M = p_rgb.shape[0]
    tm = _pick_row_tile(M)
    Mp = _round_up(M, tm)                               # pad rows (no tm=M fallback)
    patches = jnp.concatenate([p_rgb, p_ir], axis=-1)
    patches = jnp.pad(patches, ((0, Mp - M), (0, Kp - K))).astype(jnp.bfloat16)

    # --- lane-dense (128-multiple) padded dims for every matmul operand ---
    C2 = 2 * cf
    C2p = _round_up(C2, 128)
    Dp = _round_up(d_model, 128)
    Nqp = _round_up(n_queries, 8)

    # Block-diagonal backbone weight: both convs in ONE MXU matmul.  The
    # encoder fusion conv consumes channels in [rgb_feat | ir_feat] order,
    # matching torch.cat((backbone_rgb(x), backbone_ir(x)), dim=1).
    w_rgb = _conv_w_to_mat(params["bb_rgb_w"])
    w_ir = _conv_w_to_mat(params["bb_ir_w"])
    wbb = jnp.zeros((Kp, C2p), jnp.float32)
    wbb = wbb.at[:k_rgb, :cf].set(w_rgb)
    wbb = wbb.at[k_rgb:K, cf:C2].set(w_ir)
    bbb = jnp.zeros((1, C2p), jnp.float32)
    bbb = bbb.at[0, :C2].set(jnp.concatenate([params["bb_rgb_b"], params["bb_ir_b"]]))

    wenc = jnp.zeros((C2p, Dp), jnp.float32).at[:C2, :d_model].set(params["enc_w"])
    benc = jnp.zeros((1, Dp), jnp.float32).at[0, :d_model].set(params["enc_b"])

    def pad_proj(w, b):
        wp = jnp.zeros((Dp, Dp), jnp.float32).at[:d_model, :d_model].set(w)
        bp = jnp.zeros((1, Dp), jnp.float32).at[0, :d_model].set(b)
        return wp, bp

    wk, bk = pad_proj(params["k_proj_w"], params["k_proj_b"])
    wv, bv = pad_proj(params["v_proj_w"], params["v_proj_b"])
    scale = 1.0 / (d_model ** 0.5)                       # fold scale into wq / bq
    wq, bq = pad_proj(params["q_proj_w"] * scale, params["q_proj_b"] * scale)

    # --- kernel 1: dual backbone + encoder fusion + decoder k/v projections ---
    k_all, v_all = backbone_encoder_kv(
        patches, wbb.astype(jnp.bfloat16), bbb, wenc.astype(jnp.bfloat16), benc,
        wk.astype(jnp.bfloat16), bk, wv.astype(jnp.bfloat16), bv, tm=tm)
    S = Ho * Wo
    k_mem = k_all[:M].reshape(B, S, Dp)                  # (B, S, Dp) bf16
    v_mem = v_all[:M].reshape(B, S, Dp)

    # --- kernel 1b: batch-invariant scaled q projection (computed once) ---
    qe = jnp.zeros((Nqp, Dp), jnp.float32).at[:n_queries, :d_model].set(
        params["query_embed"]).astype(jnp.bfloat16)
    q = q_projection(qe, wq.astype(jnp.bfloat16), bq)    # (Nqp, Dp) bf16

    # --- fused, lane-padded prediction heads: [classes | boxes | zero pad] ---
    wh = jnp.zeros((Dp, NH), jnp.float32)
    wh = wh.at[:d_model, :n_classes].set(params["cls_w"])
    wh = wh.at[:d_model, n_classes:n_out].set(params["box_w"])
    bh = jnp.zeros((1, NH), jnp.float32)
    bh = bh.at[0, :n_classes].set(params["cls_b"])
    bh = bh.at[0, n_classes:n_out].set(params["box_b"])
    box_mask = jnp.zeros((1, NH), jnp.float32).at[0, n_classes:n_out].set(1.0)

    # --- kernel 2: S-tiled cross attention + fused heads, one call ---
    head = decoder_attn_heads(q, k_mem, v_mem, wh.astype(jnp.bfloat16), bh, box_mask)

    logits = head[:, :n_queries, :n_classes]
    boxes = head[:, :n_queries, n_classes:n_out]
    return {"pred_logits": logits, "pred_boxes": boxes}


# ---------------------------------------------------------------------------
# Deterministic parameter init (synthetic, not a checkpoint)
# ---------------------------------------------------------------------------
def init_params(key, c_rgb=3, c_ir=1, c_feat=32, d_model=32, n_queries=8, n_classes=4):
    ks = jax.random.split(key, 10)

    def nrm(k, shape, scale):
        return (scale * jax.random.normal(k, shape)).astype(jnp.float32)

    return {
        "bb_rgb_w": nrm(ks[0], (c_feat, c_rgb, 3, 3), 0.1),
        "bb_rgb_b": jnp.zeros((c_feat,), jnp.float32),
        "bb_ir_w": nrm(ks[1], (c_feat, c_ir, 3, 3), 0.1),
        "bb_ir_b": jnp.zeros((c_feat,), jnp.float32),
        "enc_w": nrm(ks[2], (2 * c_feat, d_model), 0.05),
        "enc_b": jnp.zeros((d_model,), jnp.float32),
        "query_embed": nrm(ks[3], (n_queries, d_model), 1.0),
        "q_proj_w": nrm(ks[4], (d_model, d_model), 0.05),
        "q_proj_b": jnp.zeros((d_model,), jnp.float32),
        "k_proj_w": nrm(ks[5], (d_model, d_model), 0.05),
        "k_proj_b": jnp.zeros((d_model,), jnp.float32),
        "v_proj_w": nrm(ks[6], (d_model, d_model), 0.05),
        "v_proj_b": jnp.zeros((d_model,), jnp.float32),
        "cls_w": nrm(ks[7], (d_model, n_classes), 0.05),
        "cls_b": jnp.zeros((n_classes,), jnp.float32),
        "box_w": nrm(ks[8], (d_model, 4), 0.05),
        "box_b": jnp.zeros((4,), jnp.float32),
    }


if __name__ == "__main__":
    key = jax.random.PRNGKey(0)
    k_rgb, k_ir, k_params = jax.random.split(key, 3)

    # PyTorch-style NCHW inputs: RGB (3 channels) and IR (1 channel), 16x16 images.
    x_rgb = jax.random.normal(k_rgb, (2, 3, 16, 16), dtype=jnp.float32)
    x_ir = jax.random.normal(k_ir, (2, 1, 16, 16), dtype=jnp.float32)

    params = init_params(k_params)

    fwd = jax.jit(rtdetr_forward)
    out = fwd(params, x_rgb, x_ir)
    out = jax.block_until_ready(out)

    assert out["pred_logits"].shape == (2, 8, 4)
    assert out["pred_boxes"].shape == (2, 8, 4)
    assert bool(jnp.all(jnp.isfinite(out["pred_logits"])))
    assert bool(jnp.all((out["pred_boxes"] >= 0.0) & (out["pred_boxes"] <= 1.0)))
    print("KERNEL_OK")
</pallas_src>

<mosaic_0001>
module attributes {stable_mosaic.version = 11 : i64} {
  func.func @_backbone_encoder_kv_kernel(%arg0: i32, %arg1: memref<64x128xbf16, #tpu.memory_space<vmem>>, %arg2: memref<128x128xbf16, #tpu.memory_space<vmem>>, %arg3: memref<1x128xf32, #tpu.memory_space<vmem>>, %arg4: memref<128x128xbf16, #tpu.memory_space<vmem>>, %arg5: memref<1x128xf32, #tpu.memory_space<vmem>>, %arg6: memref<128x128xbf16, #tpu.memory_space<vmem>>, %arg7: memref<1x128xf32, #tpu.memory_space<vmem>>, %arg8: memref<128x128xbf16, #tpu.memory_space<vmem>>, %arg9: memref<1x128xf32, #tpu.memory_space<vmem>>, %arg10: memref<64x128xbf16, #tpu.memory_space<vmem>>, %arg11: memref<64x128xbf16, #tpu.memory_space<vmem>>) attributes {dimension_semantics = [#tpu.dimension_semantics<parallel>], iteration_bounds = array<i64: 2>, scalar_prefetch = 0 : i64, scratch_operands = 0 : i64, tpu.core_type = #tpu.core_type<tc>, window_params = [{transform_indices = @transform_0, window_bounds = array<i64: 64, 128>}, {pipeline_mode = #tpu.pipeline_mode<synchronous>, transform_indices = @transform_1, window_bounds = array<i64: 128, 128>}, {pipeline_mode = #tpu.pipeline_mode<synchronous>, transform_indices = @transform_2, window_bounds = array<i64: 1, 128>}, {pipeline_mode = #tpu.pipeline_mode<synchronous>, transform_indices = @transform_3, window_bounds = array<i64: 128, 128>}, {pipeline_mode = #tpu.pipeline_mode<synchronous>, transform_indices = @transform_4, window_bounds = array<i64: 1, 128>}, {pipeline_mode = #tpu.pipeline_mode<synchronous>, transform_indices = @transform_5, window_bounds = array<i64: 128, 128>}, {pipeline_mode = #tpu.pipeline_mode<synchronous>, transform_indices = @transform_6, window_bounds = array<i64: 1, 128>}, {pipeline_mode = #tpu.pipeline_mode<synchronous>, transform_indices = @transform_7, window_bounds = array<i64: 128, 128>}, {pipeline_mode = #tpu.pipeline_mode<synchronous>, transform_indices = @transform_8, window_bounds = array<i64: 1, 128>}, {transform_indices = @transform_9, window_bounds = array<i64: 64, 128>}, {transform_indices = @transform_10, window_bounds = array<i64: 64, 128>}]} {
    %c0 = arith.constant 0 : index
    %c0_0 = arith.constant 0 : index
    %0 = vector.load %arg1[%c0, %c0_0] : memref<64x128xbf16, #tpu.memory_space<vmem>>, vector<64x128xbf16>
    %c0_1 = arith.constant 0 : index
    %c0_2 = arith.constant 0 : index
    %1 = vector.load %arg2[%c0_1, %c0_2] : memref<128x128xbf16, #tpu.memory_space<vmem>>, vector<128x128xbf16>
    %cst = arith.constant dense<0.000000e+00> : vector<64x128xf32>
    %2 = tpu.matmul %0, %1, %cst {dimension_numbers = #tpu.dot_dimension_numbers<[1], [0], [0], [1], [0, 0, 1, 1], [], []>} : vector<64x128xbf16>, vector<128x128xbf16>, vector<64x128xf32> -> vector<64x128xf32>
    %c0_3 = arith.constant 0 : index
    %c0_4 = arith.constant 0 : index
    %3 = vector.load %arg3[%c0_3, %c0_4] : memref<1x128xf32, #tpu.memory_space<vmem>>, vector<1x128xf32>
    %4 = vector.broadcast %3 : vector<1x128xf32> to vector<64x128xf32>
    %5 = arith.addf %2, %4 : vector<64x128xf32>
    %cst_5 = arith.constant 0.000000e+00 : f32
    %6 = vector.broadcast %cst_5 : f32 to vector<64x128xf32>
    %7 = arith.maximumf %5, %6 : vector<64x128xf32>
    %8 = arith.truncf %7 : vector<64x128xf32> to vector<64x128xbf16>
    %c0_6 = arith.constant 0 : index
    %c0_7 = arith.constant 0 : index
    %9 = vector.load %arg4[%c0_6, %c0_7] : memref<128x128xbf16, #tpu.memory_space<vmem>>, vector<128x128xbf16>
    %cst_8 = arith.constant dense<0.000000e+00> : vector<64x128xf32>
    %10 = tpu.matmul %8, %9, %cst_8 {dimension_numbers = #tpu.dot_dimension_numbers<[1], [0], [0], [1], [0, 0, 1, 1], [], []>} : vector<64x128xbf16>, vector<128x128xbf16>, vector<64x128xf32> -> vector<64x128xf32>
    %c0_9 = arith.constant 0 : index
    %c0_10 = arith.constant 0 : index
    %11 = vector.load %arg5[%c0_9, %c0_10] : memref<1x128xf32, #tpu.memory_space<vmem>>, vector<1x128xf32>
    %12 = vector.broadcast %11 : vector<1x128xf32> to vector<64x128xf32>
    %13 = arith.addf %10, %12 : vector<64x128xf32>
    %cst_11 = arith.constant 0.000000e+00 : f32
    %14 = vector.broadcast %cst_11 : f32 to vector<64x128xf32>
    %15 = arith.maximumf %13, %14 : vector<64x128xf32>
    %16 = arith.truncf %15 : vector<64x128xf32> to vector<64x128xbf16>
    %c0_12 = arith.constant 0 : index
    %c0_13 = arith.constant 0 : index
    %17 = vector.load %arg6[%c0_12, %c0_13] : memref<128x128xbf16, #tpu.memory_space<vmem>>, vector<128x128xbf16>
    %cst_14 = arith.constant dense<0.000000e+00> : vector<64x128xf32>
    %18 = tpu.matmul %16, %17, %cst_14 {dimension_numbers = #tpu.dot_dimension_numbers<[1], [0], [0], [1], [0, 0, 1, 1], [], []>} : vector<64x128xbf16>, vector<128x128xbf16>, vector<64x128xf32> -> vector<64x128xf32>
    %c0_15 = arith.constant 0 : index
    %c0_16 = arith.constant 0 : index
    %19 = vector.load %arg7[%c0_15, %c0_16] : memref<1x128xf32, #tpu.memory_space<vmem>>, vector<1x128xf32>
    %20 = vector.broadcast %19 : vector<1x128xf32> to vector<64x128xf32>
    %21 = arith.addf %18, %20 : vector<64x128xf32>
    %c0_17 = arith.constant 0 : index
    %c0_18 = arith.constant 0 : index
    %22 = vector.load %arg8[%c0_17, %c0_18] : memref<128x128xbf16, #tpu.memory_space<vmem>>, vector<128x128xbf16>
    %cst_19 = arith.constant dense<0.000000e+00> : vector<64x128xf32>
    %23 = tpu.matmul %16, %22, %cst_19 {dimension_numbers = #tpu.dot_dimension_numbers<[1], [0], [0], [1], [0, 0, 1, 1], [], []>} : vector<64x128xbf16>, vector<128x128xbf16>, vector<64x128xf32> -> vector<64x128xf32>
    %c0_20 = arith.constant 0 : index
    %c0_21 = arith.constant 0 : index
    %24 = vector.load %arg9[%c0_20, %c0_21] : memref<1x128xf32, #tpu.memory_space<vmem>>, vector<1x128xf32>
    %25 = vector.broadcast %24 : vector<1x128xf32> to vector<64x128xf32>
    %26 = arith.addf %23, %25 : vector<64x128xf32>
    %27 = arith.truncf %21 : vector<64x128xf32> to vector<64x128xbf16>
    %c0_22 = arith.constant 0 : index
    %c0_23 = arith.constant 0 : index
    %28 = vector.load %arg10[%c0_22, %c0_23] : memref<64x128xbf16, #tpu.memory_space<vmem>>, vector<64x128xbf16>
    tpu.vector_store %arg10[%c0_22, %c0_23], %27 {strides = array<i32>} : memref<64x128xbf16, #tpu.memory_space<vmem>>, vector<64x128xbf16>,
    %29 = arith.truncf %26 : vector<64x128xf32> to vector<64x128xbf16>
    %c0_24 = arith.constant 0 : index
    %c0_25 = arith.constant 0 : index
    %30 = vector.load %arg11[%c0_24, %c0_25] : memref<64x128xbf16, #tpu.memory_space<vmem>>, vector<64x128xbf16>
    tpu.vector_store %arg11[%c0_24, %c0_25], %29 {strides = array<i32>} : memref<64x128xbf16, #tpu.memory_space<vmem>>, vector<64x128xbf16>,
    return
  }
  func.func @transform_0(%arg0: i32) -> (i32, i32) {
    %c0_i32 = arith.constant 0 : i32
    %c0_i32_0 = arith.constant 0 : i32
    return %arg0, %c0_i32 : i32, i32
  }
  func.func @transform_1(%arg0: i32) -> (i32, i32) {
    %c0_i32 = arith.constant 0 : i32
    %c0_i32_0 = arith.constant 0 : i32
    %c0_i32_1 = arith.constant 0 : i32
    return %c0_i32, %c0_i32_0 : i32, i32
  }
  func.func @transform_2(%arg0: i32) -> (i32, i32) {
    %c0_i32 = arith.constant 0 : i32
    %c0_i32_0 = arith.constant 0 : i32
    %c0_i32_1 = arith.constant 0 : i32
    return %c0_i32, %c0_i32_0 : i32, i32
  }
  func.func @transform_3(%arg0: i32) -> (i32, i32) {
    %c0_i32 = arith.constant 0 : i32
    %c0_i32_0 = arith.constant 0 : i32
    %c0_i32_1 = arith.constant 0 : i32
    return %c0_i32, %c0_i32_0 : i32, i32
  }
  func.func @transform_4(%arg0: i32) -> (i32, i32) {
    %c0_i32 = arith.constant 0 : i32
    %c0_i32_0 = arith.constant 0 : i32
    %c0_i32_1 = arith.constant 0 : i32
    return %c0_i32, %c0_i32_0 : i32, i32
  }
  func.func @transform_5(%arg0: i32) -> (i32, i32) {
    %c0_i32 = arith.constant 0 : i32
    %c0_i32_0 = arith.constant 0 : i32
    %c0_i32_1 = arith.constant 0 : i32
    return %c0_i32, %c0_i32_0 : i32, i32
  }
  func.func @transform_6(%arg0: i32) -> (i32, i32) {
    %c0_i32 = arith.constant 0 : i32
    %c0_i32_0 = arith.constant 0 : i32
    %c0_i32_1 = arith.constant 0 : i32
    return %c0_i32, %c0_i32_0 : i32, i32
  }
  func.func @transform_7(%arg0: i32) -> (i32, i32) {
    %c0_i32 = arith.constant 0 : i32
    %c0_i32_0 = arith.constant 0 : i32
    %c0_i32_1 = arith.constant 0 : i32
    return %c0_i32, %c0_i32_0 : i32, i32
  }
  func.func @transform_8(%arg0: i32) -> (i32, i32) {
    %c0_i32 = arith.constant 0 : i32
    %c0_i32_0 = arith.constant 0 : i32
    %c0_i32_1 = arith.constant 0 : i32
    return %c0_i32, %c0_i32_0 : i32, i32
  }
  func.func @transform_9(%arg0: i32) -> (i32, i32) {
    %c0_i32 = arith.constant 0 : i32
    %c0_i32_0 = arith.constant 0 : i32
    return %arg0, %c0_i32 : i32, i32
  }
  func.func @transform_10(%arg0: i32) -> (i32, i32) {
    %c0_i32 = arith.constant 0 : i32
    %c0_i32_0 = arith.constant 0 : i32
    return %arg0, %c0_i32 : i32, i32
  }
}

module attributes {stable_mosaic.version = 11 : i64} {
  func.func @_decoder_attn_heads_kernel(%arg0: i32, %arg1: i32, %arg2: memref<8x128xbf16, #tpu.memory_space<vmem>>, %arg3: memref<1x32x128xbf16, #tpu.memory_space<vmem>>, %arg4: memref<1x32x128xbf16, #tpu.memory_space<vmem>>, %arg5: memref<128x128xbf16, #tpu.memory_space<vmem>>, %arg6: memref<1x128xf32, #tpu.memory_space<vmem>>, %arg7: memref<1x128xf32, #tpu.memory_space<vmem>>, %arg8: memref<1x8x128xf32, #tpu.memory_space<vmem>>, %arg9: memref<8x1xf32, #tpu.memory_space<vmem>>, %arg10: memref<8x1xf32, #tpu.memory_space<vmem>>, %arg11: memref<8x128xf32, #tpu.memory_space<vmem>>) attributes {dimension_semantics = [#tpu.dimension_semantics<parallel>, #tpu.dimension_semantics<arbitrary>], iteration_bounds = array<i64: 2, 2>, scalar_prefetch = 0 : i64, scratch_operands = 3 : i64, tpu.core_type = #tpu.core_type<tc>, window_params = [{pipeline_mode = #tpu.pipeline_mode<synchronous>, transform_indices = @transform_0, window_bounds = array<i64: 8, 128>}, {transform_indices = @transform_1, window_bounds = array<i64: 1, 32, 128>}, {transform_indices = @transform_2, window_bounds = array<i64: 1, 32, 128>}, {pipeline_mode = #tpu.pipeline_mode<synchronous>, transform_indices = @transform_3, window_bounds = array<i64: 128, 128>}, {pipeline_mode = #tpu.pipeline_mode<synchronous>, transform_indices = @transform_4, window_bounds = array<i64: 1, 128>}, {pipeline_mode = #tpu.pipeline_mode<synchronous>, transform_indices = @transform_5, window_bounds = array<i64: 1, 128>}, {transform_indices = @transform_6, window_bounds = array<i64: 1, 8, 128>}]} {
    %c0_i32 = arith.constant 0 : i32
    %0 = arith.cmpi eq, %arg1, %c0_i32 : i32
    %1 = arith.extui %0 : i1 to i32
    %c0_i32_0 = arith.constant 0 : i32
    %2 = arith.cmpi ne, %1, %c0_i32_0 : i32
    scf.if %2 {
      %cst_26 = arith.constant 0xFF800000 : f32
      %36 = vector.broadcast %cst_26 : f32 to vector<8x1xf32>
      %c0_27 = arith.constant 0 : index
      %c0_28 = arith.constant 0 : index
      %37 = vector.load %arg9[%c0_27, %c0_28] : memref<8x1xf32, #tpu.memory_space<vmem>>, vector<8x1xf32>
      tpu.vector_store %arg9[%c0_27, %c0_28], %36 {strides = array<i32>} : memref<8x1xf32, #tpu.memory_space<vmem>>, vector<8x1xf32>,
      %cst_29 = arith.constant 0.000000e+00 : f32
      %38 = vector.broadcast %cst_29 : f32 to vector<8x1xf32>
      %c0_30 = arith.constant 0 : index
      %c0_31 = arith.constant 0 : index
      %39 = vector.load %arg10[%c0_30, %c0_31] : memref<8x1xf32, #tpu.memory_space<vmem>>, vector<8x1xf32>
      tpu.vector_store %arg10[%c0_30, %c0_31], %38 {strides = array<i32>} : memref<8x1xf32, #tpu.memory_space<vmem>>, vector<8x1xf32>,
      %cst_32 = arith.constant 0.000000e+00 : f32
      %40 = vector.broadcast %cst_32 : f32 to vector<8x128xf32>
      %c0_33 = arith.constant 0 : index
      %c0_34 = arith.constant 0 : index
      %41 = vector.load %arg11[%c0_33, %c0_34] : memref<8x128xf32, #tpu.memory_space<vmem>>, vector<8x128xf32>
      tpu.vector_store %arg11[%c0_33, %c0_34], %40 {strides = array<i32>} : memref<8x128xf32, #tpu.memory_space<vmem>>, vector<8x128xf32>,
    } else {
    }
    %c0 = arith.constant 0 : index
    %c0_1 = arith.constant 0 : index
    %3 = vector.load %arg2[%c0, %c0_1] : memref<8x128xbf16, #tpu.memory_space<vmem>>, vector<8x128xbf16>
    %c0_2 = arith.constant 0 : index
    %c0_3 = arith.constant 0 : index
    %c0_4 = arith.constant 0 : index
    %4 = vector.load %arg3[%c0_2, %c0_3, %c0_4] : memref<1x32x128xbf16, #tpu.memory_space<vmem>>, vector<1x32x128xbf16>
    %5 = vector.shape_cast %4 : vector<1x32x128xbf16> to vector<32x128xbf16>
    %c0_5 = arith.constant 0 : index
    %c0_6 = arith.constant 0 : index
    %c0_7 = arith.constant 0 : index
    %6 = vector.load %arg4[%c0_5, %c0_6, %c0_7] : memref<1x32x128xbf16, #tpu.memory_space<vmem>>, vector<1x32x128xbf16>
    %7 = vector.shape_cast %6 : vector<1x32x128xbf16> to vector<32x128xbf16>
    %cst = arith.constant dense<0.000000e+00> : vector<8x32xf32>
    %8 = tpu.matmul %3, %5, %cst {dimension_numbers = #tpu.dot_dimension_numbers<[1], [1], [0], [0], [0, 0, 1, 0], [], []>} : vector<8x128xbf16>, vector<32x128xbf16>, vector<8x32xf32> -> vector<8x32xf32>
    %c0_8 = arith.constant 0 : index
    %c0_9 = arith.constant 0 : index
    %9 = vector.load %arg9[%c0_8, %c0_9] : memref<8x1xf32, #tpu.memory_space<vmem>>, vector<8x1xf32>
    %cst_10 = arith.constant dense<0xFF800000> : vector<8xf32>
    %10 = vector.multi_reduction <maximumf>, %8, %cst_10 [1] : vector<8x32xf32> to vector<8xf32>
    %11 = vector.shape_cast %10 : vector<8xf32> to vector<8x1xf32>
    %12 = arith.maximumf %9, %11 : vector<8x1xf32>
    %c0_11 = arith.constant 0 : index
    %c0_12 = arith.constant 0 : index
    %13 = vector.load %arg9[%c0_11, %c0_12] : memref<8x1xf32, #tpu.memory_space<vmem>>, vector<8x1xf32>
    %14 = arith.subf %13, %12 : vector<8x1xf32>
    %15 = math.exp %14 : vector<8x1xf32>
    %16 = vector.broadcast %12 : vector<8x1xf32> to vector<8x32xf32>
    %17 = arith.subf %8, %16 : vector<8x32xf32>
    %18 = math.exp %17 : vector<8x32xf32>
    %c0_13 = arith.constant 0 : index
    %c0_14 = arith.constant 0 : index
    %19 = vector.load %arg10[%c0_13, %c0_14] : memref<8x1xf32, #tpu.memory_space<vmem>>, vector<8x1xf32>
    %20 = arith.mulf %15, %19 : vector<8x1xf32>
    %cst_15 = arith.constant dense<0.000000e+00> : vector<8xf32>
    %21 = vector.multi_reduction <add>, %18, %cst_15 [1] : vector<8x32xf32> to vector<8xf32>
    %22 = vector.shape_cast %21 : vector<8xf32> to vector<8x1xf32>
    %23 = arith.addf %20, %22 : vector<8x1xf32>
    %c0_16 = arith.constant 0 : index
    %c0_17 = arith.constant 0 : index
    %24 = vector.load %arg10[%c0_16, %c0_17] : memref<8x1xf32, #tpu.memory_space<vmem>>, vector<8x1xf32>
    tpu.vector_store %arg10[%c0_16, %c0_17], %23 {strides = array<i32>} : memref<8x1xf32, #tpu.memory_space<vmem>>, vector<8x1xf32>,
    %c0_18 = arith.constant 0 : index
    %c0_19 = arith.constant 0 : index
    %25 = vector.load %arg11[%c0_18, %c0_19] : memref<8x128xf32, #tpu.memory_space<vmem>>, vector<8x128xf32>
    %26 = vector.broadcast %15 : vector<8x1xf32> to vector<8x128xf32>
    %27 = arith.mulf %26, %25 : vector<8x128xf32>
    %28 = arith.truncf %18 : vector<8x32xf32> to vector<8x32xbf16>
    %cst_20 = arith.constant dense<0.000000e+00> : vector<8x128xf32>
    %29 = tpu.matmul %28, %7, %cst_20 {dimension_numbers = #tpu.dot_dimension_numbers<[1], [0], [0], [1], [0, 0, 1, 1], [], []>} : vector<8x32xbf16>, vector<32x128xbf16>, vector<8x128xf32> -> vector<8x128xf32>
    %30 = arith.addf %27, %29 : vector<8x128xf32>
    %c0_21 = arith.constant 0 : index
    %c0_22 = arith.constant 0 : index
    %31 = vector.load %arg11[%c0_21, %c0_22] : memref<8x128xf32, #tpu.memory_space<vmem>>, vector<8x128xf32>
    tpu.vector_store %arg11[%c0_21, %c0_22], %30 {strides = array<i32>} : memref<8x128xf32, #tpu.memory_space<vmem>>, vector<8x128xf32>,
    %c0_23 = arith.constant 0 : index
    %c0_24 = arith.constant 0 : index
    %32 = vector.load %arg9[%c0_23, %c0_24] : memref<8x1xf32, #tpu.memory_space<vmem>>, vector<8x1xf32>
    tpu.vector_store %arg9[%c0_23, %c0_24], %12 {strides = array<i32>} : memref<8x1xf32, #tpu.memory_space<vmem>>, vector<8x1xf32>,
    %c1_i32 = arith.constant 1 : i32
    %33 = arith.cmpi eq, %arg1, %c1_i32 : i32
    %34 = arith.extui %33 : i1 to i32
    %c0_i32_25 = arith.constant 0 : i32
    %35 = arith.cmpi ne, %34, %c0_i32_25 : i32
    scf.if %35 {
      %c0_26 = arith.constant 0 : index
      %c0_27 = arith.constant 0 : index
      %36 = vector.load %arg11[%c0_26, %c0_27] : memref<8x128xf32, #tpu.memory_space<vmem>>, vector<8x128xf32>
      %c0_28 = arith.constant 0 : index
      %c0_29 = arith.constant 0 : index
      %37 = vector.load %arg10[%c0_28, %c0_29] : memref<8x1xf32, #tpu.memory_space<vmem>>, vector<8x1xf32>
      %38 = tpu.reciprocal %37 {approx = true} : vector<8x1xf32> -> vector<8x1xf32>
      %39 = vector.broadcast %38 : vector<8x1xf32> to vector<8x128xf32>
      %40 = arith.mulf %36, %39 : vector<8x128xf32>
      %41 = arith.truncf %40 : vector<8x128xf32> to vector<8x128xbf16>
      %c0_30 = arith.constant 0 : index
      %c0_31 = arith.constant 0 : index
      %42 = vector.load %arg5[%c0_30, %c0_31] : memref<128x128xbf16, #tpu.memory_space<vmem>>, vector<128x128xbf16>
      %cst_32 = arith.constant dense<0.000000e+00> : vector<8x128xf32>
      %43 = tpu.matmul %41, %42, %cst_32 {dimension_numbers = #tpu.dot_dimension_numbers<[1], [0], [0], [1], [0, 0, 1, 1], [], []>} : vector<8x128xbf16>, vector<128x128xbf16>, vector<8x128xf32> -> vector<8x128xf32>
      %c0_33 = arith.constant 0 : index
      %c0_34 = arith.constant 0 : index
      %44 = vector.load %arg6[%c0_33, %c0_34] : memref<1x128xf32, #tpu.memory_space<vmem>>, vector<1x128xf32>
      %45 = vector.broadcast %44 : vector<1x128xf32> to vector<8x128xf32>
      %46 = arith.addf %43, %45 : vector<8x128xf32>
      %c0_35 = arith.constant 0 : index
      %c0_36 = arith.constant 0 : index
      %47 = vector.load %arg7[%c0_35, %c0_36] : memref<1x128xf32, #tpu.memory_space<vmem>>, vector<1x128xf32>
      %cst_37 = arith.constant 5.000000e-01 : f32
      %48 = vector.broadcast %cst_37 : f32 to vector<1x128xf32>
      %49 = arith.cmpf ogt, %47, %48 : vector<1x128xf32>
      %50 = arith.negf %46 : vector<8x128xf32>
      %51 = math.exp %50 : vector<8x128xf32>
      %cst_38 = arith.constant 1.000000e+00 : f32
      %52 = vector.broadcast %cst_38 : f32 to vector<8x128xf32>
      %53 = arith.addf %52, %51 : vector<8x128xf32>
      %54 = arith.divf %52, %53 : vector<8x128xf32>
      %55 = vector.shape_cast %49 : vector<1x128xi1> to vector<1x128xi1>
      %56 = vector.broadcast %55 : vector<1x128xi1> to vector<8x128xi1>
      %57 = arith.select %56, %54, %46 : vector<8x128xi1>, vector<8x128xf32>
      %c0_39 = arith.constant 0 : index
      %c0_40 = arith.constant 0 : index
      %c0_41 = arith.constant 0 : index
      %58 = vector.load %arg8[%c0_39, %c0_40, %c0_41] : memref<1x8x128xf32, #tpu.memory_space<vmem>>, vector<1x8x128xf32>
      %59 = vector.shape_cast %58 : vector<1x8x128xf32> to vector<8x128xf32>
      %60 = vector.shape_cast %57 : vector<8x128xf32> to vector<1x8x128xf32>
      tpu.vector_store %arg8[%c0_39, %c0_40, %c0_41], %60 {strides = array<i32>} : memref<1x8x128xf32, #tpu.memory_space<vmem>>, vector<1x8x128xf32>,
    } else {
    }
    return
  }
  func.func @transform_0(%arg0: i32, %arg1: i32) -> (i32, i32) {
    %c0_i32 = arith.constant 0 : i32
    %c0_i32_0 = arith.constant 0 : i32
    %c0_i32_1 = arith.constant 0 : i32
    return %c0_i32, %c0_i32_0 : i32, i32
  }
  func.func @transform_1(%arg0: i32, %arg1: i32) -> (i32, i32, i32) {
    %c0_i32 = arith.constant 0 : i32
    %c0_i32_0 = arith.constant 0 : i32
    return %arg0, %arg1, %c0_i32 : i32, i32, i32
  }
  func.func @transform_2(%arg0: i32, %arg1: i32) -> (i32, i32, i32) {
    %c0_i32 = arith.constant 0 : i32
    %c0_i32_0 = arith.constant 0 : i32
    return %arg0, %arg1, %c0_i32 : i32, i32, i32
  }
  func.func @transform_3(%arg0: i32, %arg1: i32) -> (i32, i32) {
    %c0_i32 = arith.constant 0 : i32
    %c0_i32_0 = arith.constant 0 : i32
    %c0_i32_1 = arith.constant 0 : i32
    return %c0_i32, %c0_i32_0 : i32, i32
  }
  func.func @transform_4(%arg0: i32, %arg1: i32) -> (i32, i32) {
    %c0_i32 = arith.constant 0 : i32
    %c0_i32_0 = arith.constant 0 : i32
    %c0_i32_1 = arith.constant 0 : i32
    return %c0_i32, %c0_i32_0 : i32, i32
  }
  func.func @transform_5(%arg0: i32, %arg1: i32) -> (i32, i32) {
    %c0_i32 = arith.constant 0 : i32
    %c0_i32_0 = arith.constant 0 : i32
    %c0_i32_1 = arith.constant 0 : i32
    return %c0_i32, %c0_i32_0 : i32, i32
  }
  func.func @transform_6(%arg0: i32, %arg1: i32) -> (i32, i32, i32) {
    %c0_i32 = arith.constant 0 : i32
    %c0_i32_0 = arith.constant 0 : i32
    %c0_i32_1 = arith.constant 0 : i32
    return %arg0, %c0_i32, %c0_i32_0 : i32, i32, i32
  }
}

module attributes {stable_mosaic.version = 11 : i64} {
  func.func @_q_proj_kernel(%arg0: i32, %arg1: memref<8x128xbf16, #tpu.memory_space<vmem>>, %arg2: memref<128x128xbf16, #tpu.memory_space<vmem>>, %arg3: memref<1x128xf32, #tpu.memory_space<vmem>>, %arg4: memref<8x128xbf16, #tpu.memory_space<vmem>>) attributes {dimension_semantics = [#tpu.dimension_semantics<arbitrary>], iteration_bounds = array<i64: 1>, scalar_prefetch = 0 : i64, scratch_operands = 0 : i64, tpu.core_type = #tpu.core_type<tc>, window_params = [{pipeline_mode = #tpu.pipeline_mode<synchronous>, transform_indices = @transform_0, window_bounds = array<i64: 8, 128>}, {pipeline_mode = #tpu.pipeline_mode<synchronous>, transform_indices = @transform_1, window_bounds = array<i64: 128, 128>}, {pipeline_mode = #tpu.pipeline_mode<synchronous>, transform_indices = @transform_2, window_bounds = array<i64: 1, 128>}, {pipeline_mode = #tpu.pipeline_mode<synchronous>, transform_indices = @transform_3, window_bounds = array<i64: 8, 128>}]} {
    %c0 = arith.constant 0 : index
    %c0_0 = arith.constant 0 : index
    %0 = vector.load %arg1[%c0, %c0_0] : memref<8x128xbf16, #tpu.memory_space<vmem>>, vector<8x128xbf16>
    %c0_1 = arith.constant 0 : index
    %c0_2 = arith.constant 0 : index
    %1 = vector.load %arg2[%c0_1, %c0_2] : memref<128x128xbf16, #tpu.memory_space<vmem>>, vector<128x128xbf16>
    %cst = arith.constant dense<0.000000e+00> : vector<8x128xf32>
    %2 = tpu.matmul %0, %1, %cst {dimension_numbers = #tpu.dot_dimension_numbers<[1], [0], [0], [1], [0, 0, 1, 1], [], []>} : vector<8x128xbf16>, vector<128x128xbf16>, vector<8x128xf32> -> vector<8x128xf32>
    %c0_3 = arith.constant 0 : index
    %c0_4 = arith.constant 0 : index
    %3 = vector.load %arg3[%c0_3, %c0_4] : memref<1x128xf32, #tpu.memory_space<vmem>>, vector<1x128xf32>
    %4 = vector.broadcast %3 : vector<1x128xf32> to vector<8x128xf32>
    %5 = arith.addf %2, %4 : vector<8x128xf32>
    %6 = arith.truncf %5 : vector<8x128xf32> to vector<8x128xbf16>
    %c0_5 = arith.constant 0 : index
    %c0_6 = arith.constant 0 : index
    %7 = vector.load %arg4[%c0_5, %c0_6] : memref<8x128xbf16, #tpu.memory_space<vmem>>, vector<8x128xbf16>
    tpu.vector_store %arg4[%c0_5, %c0_6], %6 {strides = array<i32>} : memref<8x128xbf16, #tpu.memory_space<vmem>>, vector<8x128xbf16>,
    return
  }
  func.func @transform_0(%arg0: i32) -> (i32, i32) {
    %c0_i32 = arith.constant 0 : i32
    %c0_i32_0 = arith.constant 0 : i32
    %c0_i32_1 = arith.constant 0 : i32
    return %c0_i32, %c0_i32_0 : i32, i32
  }
  func.func @transform_1(%arg0: i32) -> (i32, i32) {
    %c0_i32 = arith.constant 0 : i32
    %c0_i32_0 = arith.constant 0 : i32
    %c0_i32_1 = arith.constant 0 : i32
    return %c0_i32, %c0_i32_0 : i32, i32
  }
  func.func @transform_2(%arg0: i32) -> (i32, i32) {
    %c0_i32 = arith.constant 0 : i32
    %c0_i32_0 = arith.constant 0 : i32
    %c0_i32_1 = arith.constant 0 : i32
    return %c0_i32, %c0_i32_0 : i32, i32
  }
  func.func @transform_3(%arg0: i32) -> (i32, i32) {
    %c0_i32 = arith.constant 0 : i32
    %c0_i32_0 = arith.constant 0 : i32
    %c0_i32_1 = arith.constant 0 : i32
    return %c0_i32, %c0_i32_0 : i32, i32
  }
}

</mosaic_0001>

<bundles_post_ra>
// kernel: rtdetr_forward.4
= control target key start
LH: loop header
LB: loop body
LE: loop exit
PB: predicated region body
PF: predicated region fallthrough
CT: control target
= control target key end

     0   :  { %v181_v0 = vmov 0.0   ;;  %vm182_vm0 = vmmov 0   ;;  %s236_s1 = inlined_call_operand.vmem [shape: bf16[128,128], index: 1, kind: input, shape index: {}]   ;;  %s237_s0 = inlined_call_operand.vmem [shape: bf16[8,128], index: 0, kind: input, shape index: {}]   ;;  %s238_s2 = inlined_call_operand.vmem [shape: f32[1,128], index: 2, kind: input, shape index: {}]   ;;  %s239_s3 = inlined_call_operand.vmem [shape: bf16[8,128], index: 3, kind: output, shape index: {}]  }
   0x1   :  { %151 = vmatprep.subr.bf16.mxu0 %v181_v0  ;;  %v173_v1 = vld [vmem:[%s236_s1] sm:$0xff]   ;;  %167 = vmatprep.mubr.msk.bf16.mxu0 %vm182_vm0, %v181_v0  ;;  %v174_v2 = vld [vmem:[%s236_s1 + $0x8] sm:$0xff]   ;;  %v175_v3 = vld [vmem:[%s236_s1 + $0x10] sm:$0xff]  }
   0x2   :  { %152 = vmatpush3.bf16.msra.mxu0 %v173_v1  ;;  %v176_v4 = vld [vmem:[%s236_s1 + $0x18] sm:$0xff]   ;;  %v177_v5 = vld [vmem:[%s236_s1 + $0x20] sm:$0xff]   ;;  %v178_v6 = vld [vmem:[%s236_s1 + $0x28] sm:$0xff]  }
   0x3   :  { %153 = vmatprep.subr.bf16.mxu0 %v181_v0  ;;  %v179_v7 = vld [vmem:[%s236_s1 + $0x30] sm:$0xff]   ;;  %v180_v8 = vld [vmem:[%s236_s1 + $0x38] sm:$0xff]   ;;  %v15_v9 = vld [vmem:[%s237_s0] sm:$0xf] }
   0x4   :  { %v133_v10 = vld [vmem:[%s238_s2] ss:$0 sm:$0xff] }
   0x6   :  { %154 = vmatpush3.bf16.msra.mxu0 %v174_v2 }
   0x7   :  { %155 = vmatprep.subr.bf16.mxu0 %v181_v0 }
   0xa   :  { %156 = vmatpush3.bf16.msra.mxu0 %v175_v3 }
   0xb   :  { %157 = vmatprep.subr.bf16.mxu0 %v181_v0 }
   0xe   :  { %158 = vmatpush3.bf16.msra.mxu0 %v176_v4 }
   0xf   :  { %159 = vmatprep.subr.bf16.mxu0 %v181_v0 }
  0x12   :  { %160 = vmatpush3.bf16.msra.mxu0 %v177_v5 }
  0x13   :  { %161 = vmatprep.subr.bf16.mxu0 %v181_v0 }
  0x16   :  { %162 = vmatpush3.bf16.msra.mxu0 %v178_v6 }
  0x17   :  { %163 = vmatprep.subr.bf16.mxu0 %v181_v0 }
  0x1a   :  { %164 = vmatpush3.bf16.msra.mxu0 %v179_v7 }
  0x1b   :  { %165 = vmatprep.subr.bf16.mxu0 %v181_v0 }
  0x1e   :  { %166 = vmatpush3.bf16.msra.mxu0 %v180_v8 }
  0x21   :  { %168 = vmatmul.mubr.bf16.vlgmr.msra.gmra.mrb[0].mxu0 %v15_v9 }
  0xf4   :  { %v121_v11 = vpop.f32.mrb[0].mxu0 }
  0xf5   :  { %v122_v12 = vadd.f32 %v133_v10, %v121_v11  ;;  %v169_v13 = vpop.f32.mrb[1].mxu0 }
  0xf6   :  { %v124_v14 = vpop.f32.mrb[2].mxu0 }
  0xf7   :  { %v127_v15 = vpack.c.bf16 %v122_v12, %v122_v12  ;;  %v170_v16 = vpop.f32.mrb[3].mxu0 }
  0xf9   :  { %128 = vst [vmem:[%s239_s3] sm:$0xf] %v127_v15 }

// kernel: rtdetr_forward.5
= control target key start
LH: loop header
LB: loop body
LE: loop exit
PB: predicated region body
PF: predicated region fallthrough
CT: control target
= control target key end

     0   :  { %s942_s21 = smov 0   ;;  %s944_s22 = smov 0   ;;  %s1046_s0 = inlined_call_operand.vmem [shape: bf16[8,128], index: 0, kind: input, shape index: {}]   ;;  %s1047_s1 = inlined_call_operand.vmem [shape: bf16[2,64,128], index: 1, kind: input, shape index: {}]   ;;  %s1048_s2 = inlined_call_operand.vmem [shape: bf16[2,64,128], index: 2, kind: input, shape index: {}]   ;;  %s1049_s3 = inlined_call_operand.vmem [shape: bf16[128,128], index: 3, kind: input, shape index: {}]   ;;  %s1050_s4 = inlined_call_operand.vmem [shape: f32[1,128], index: 4, kind: input, shape index: {}]   ;;  %s1051_s5 = inlined_call_operand.vmem [shape: f32[1,128], index: 5, kind: input, shape index: {}]   ;;  %s1052_s6 = inlined_call_operand.vmem [shape: f32[2,8,128], index: 6, kind: output, shape index: {}]  }
   0x1   :  { %s946_s23 = smov 0   ;;  %s948_s24 = smov 0  }
   0x2   :  { %s950_s25 = smov 0  }
   0x3 LB: > { %s25_s26 = sadd.s32 1, %s889_s23  ;;  %s28_s27 = sadd.s32 1, %s893_s24  ;;  %s897_s25 = sphi %s950_s25, %s16_s25   ;;  %s893_s24 = sphi %s948_s24, %s1056_s24   ;;  %s889_s23 = sphi %s946_s23, %s1055_s23   ;;  %s885_s22 = sphi %s944_s22, %s1054_s22   ;;  %s881_s21 = sphi %s942_s21, %s1053_s21  }
   0x4   : > { %p26_p0 = scmp.ge.s32.totalorder %s25_s26, 2  ;;  %p708_p1 = scmp.ge.s32.totalorder %s897_s25, 1 }
   0x5   : > { %p248_p2 = scmp.lt.s32.totalorder %s897_s25, 5 }
   0x6   : > { %s1058_s26 = smov (%p26_p0, %s25_s26), 0  ;;  %s1060_s27 = smov (!%p26_p0, %s28_s27), %s893_s24 }
   0x7   : > { %p249_p3 = pnand %p708_p1, %p248_p2  ;;  %p30_p4 = scmp.ge.s32.totalorder %s1060_s27, 2 }
   0x8   : > { %s709_s28 = sshll.u32 (!%p249_p3), %s881_s21, 2  ;;  %p291_p5 = scmp.lt.s32.totalorder (!%p249_p3), %s885_s22, 1 }
   0x9   : > { %s1062_s27 = smov (%p30_p4, %s1060_s27), 0  ;;  %252 = sbr.rel (%p249_p3) target bundleno = 1079 (0x437), region = 44 }
   0xa   : > { %p293_p6 = scmp.lt.s32.totalorder (!%p249_p3), %s709_s28, 7  ;;  %p716_p7 = scmp.ne.s32.totalorder (!%p249_p3), %s881_s21, 0 }
  0x10   : > { %s1064_s22 = smov (!%p291_p5, %s885_s22), 1  ;;  %s1066_s28 = smov (!%p293_p6, %s709_s28), 7 }
  0x11   : > { %s710_s29 = sshll.u32 %s1064_s22, 3  ;;  %318 = sbr.rel (%p716_p7) target bundleno = 24 (0x18), region = 48  ;;  %vm319_vm0 = vcmask (!%p716_p7), 7168   ;;  %v899_v0 = vmov (!%p716_p7), -inf   ;;  %v900_v1 = vmov (!%p716_p7), 0.0  }
  0x12   : > { %s296_s30 = sadd.s32 %s710_s29, %s1066_s28  ;;  %s978_s9 = scalar_lea.vmem %s1052_s6, %s710_s29  ;;  %320 = vst.msk [vmem:[#allocation2] sm:$0xff] (!%p716_p7), %vm319_vm0, %v899_v0  ;;  %321 = vst.msk [vmem:[#allocation3] sm:$0xff] (!%p716_p7), %vm319_vm0, %v900_v1 }
  0x13   : > { %s711_s10 = sshll.u32 %s296_s30, 2  ;;  %322 = vst [vmem:[#allocation4] sm:$0xff] (!%p716_p7), %v900_v1 }
  0x14   : > { %s298_s13 = scalar_lea.vmem %s1047_s1, %s711_s10  ;;  %s986_s16 = scalar_lea.vmem %s1048_s2, %s711_s10 }
  0x18 PF: > { %v836_v2 = vld [vmem:[%s298_s13] sm:$0xff]   ;;  %v901_v3 = vmov 0.0   ;;  %vm902_vm1 = vmmov 0   ;;  %v837_v4 = vld [vmem:[%s298_s13 + $0x8] sm:$0xff]   ;;  %vm385_vm2 = vcmask 261120   ;;  %v903_v11 = vmov 0  }
  0x19   : > { %750 = vmatprep.subr.bf16.mxu0 %v901_v3  ;;  %758 = vmatprep.subr.bf16.mxu1 %v901_v3  ;;  %v323_v5 = vld [vmem:[%s1046_s0] sm:$0xf]  ;;  %vm407_vm3 = vcmask 7168   ;;  %v839_v17 = vld [vmem:[%s986_s16 + $0x8] sm:$0xff]   ;;  %p722_p8 = scmp.ne.s32.totalorder %s881_s21, 1 }
  0x1a   : > { %751 = vmatpush3.bf16.xpose.msra.mxu0 %v836_v2  ;;  %754 = vmatprep.mubr.msk.bf16.mxu0 %vm902_vm1, %v901_v3  ;;  %v384_v12 = vld [vmem:[#allocation2] sm:$0xff]  ;;  %v401_v26 = vld [vmem:[#allocation3] sm:$0xff]  ;;  %v409_v30 = vld [vmem:[#allocation4] sm:$0xff]  ;;  %v904_v40 = vmov (!%p722_p8), 0   ;;  %v905_v41 = vmov (!%p722_p8), 0.0   ;;  %vm906_vm4 = vmmov (!%p722_p8), 0   ;;  %v609_v61 = vlaneseq (!%p722_p8) }
  0x1b   : > { %752 = vmatprep.subr.bf16.mxu0 %v901_v3  ;;  %762 = vmatprep.mubr.msk.bf16.mxu1 %vm902_vm1, %v901_v3  ;;  %v838_v16 = vld [vmem:[%s986_s16] sm:$0xff]   ;;  %v846_v42 = vld [vmem:[%s1049_s3 + $0x8] sm:$0xff] (!%p722_p8)   ;;  %v847_v43 = vld [vmem:[%s1049_s3 + $0x10] sm:$0xff] (!%p722_p8)  }
  0x1c   : > { %834 = vset.pattern.permute.xlu0 %v903_v11  ;;  %835 = vset.pattern.permute.xlu1 %v903_v11  ;;  %v845_v39 = vld [vmem:[%s1049_s3] sm:$0xff] (!%p722_p8)   ;;  %v848_v44 = vld [vmem:[%s1049_s3 + $0x18] sm:$0xff] (!%p722_p8)   ;;  %v850_v47 = vld [vmem:[%s1049_s3 + $0x28] sm:$0xff] (!%p722_p8)   ;;  %v610_v63 = vshrl.u32 (!%p722_p8), %v609_v61, 7 }
  0x1d   : > { %759 = vmatpush3.bf16.msra.mxu1 %v838_v16  ;;  %v849_v46 = vld [vmem:[%s1049_s3 + $0x20] sm:$0xff] (!%p722_p8)   ;;  %v851_v48 = vld [vmem:[%s1049_s3 + $0x30] sm:$0xff] (!%p722_p8)   ;;  %v852_v49 = vld [vmem:[%s1049_s3 + $0x38] sm:$0xff] (!%p722_p8)  }
  0x1e   : > { %760 = vmatprep.subr.bf16.mxu1 %v901_v3  ;;  %v723_v54 = vld [vmem:[%s1050_s4] ss:$0 sm:$0xff] (!%p722_p8)  ;;  %v611_v2 = vsub.s32 (!%p722_p8), 0, %v610_v63 }
  0x1f   : > { %v600_v62 = vld [vmem:[%s1051_s5] sm:$0x1] (!%p722_p8) }
  0x20   : > { %vm601_vm5 = vcmp.gt.f32.partialorder (!%p722_p8), %v600_v62, 0.5 }
  0x21   : > { %761 = vmatpush3.bf16.msra.mxu1 %v839_v17  ;;  %v608_v3 = vsel (!%p722_p8), %vm601_vm5, 1, %v904_v40 }
  0x22   : > { %753 = vmatpush3.bf16.xpose.msra.mxu0 %v837_v4  ;;  %v612_v4 = vrot.slane (!%p722_p8), %v608_v3, %v611_v2 }
  0x23   : > { %766 = vmatprep.subr.bf16.mxu0 (!%p722_p8), %v905_v41 }
  0x24   : > { %vm613_vm6 = vcmp.eq.s32.totalorder (!%p722_p8), %v612_v4, 1 }
  0x29   : > { %755 = vmatmul.mubr.bf16.vlgmr.msra.gmra.mrb[0].mxu0 %v323_v5 }
  0x2a   : > { %767 = vmatpush3.bf16.msra.mxu0 (!%p722_p8), %v845_v39  ;;  %782 = vmatprep.mubr.msk.bf16.mxu0 (!%p722_p8), %vm906_vm4, %v905_v41 }
  0x2b   : > { %768 = vmatprep.subr.bf16.mxu0 (!%p722_p8), %v905_v41 }
  0x2e   : > { %769 = vmatpush3.bf16.msra.mxu0 (!%p722_p8), %v846_v42 }
  0x2f   : > { %770 = vmatprep.subr.bf16.mxu0 (!%p722_p8), %v905_v41 }
  0x32   : > { %771 = vmatpush3.bf16.msra.mxu0 (!%p722_p8), %v847_v43 }
  0x33   : > { %772 = vmatprep.subr.bf16.mxu0 (!%p722_p8), %v905_v41 }
  0x36   : > { %773 = vmatpush3.bf16.msra.mxu0 (!%p722_p8), %v848_v44 }
  0x37   : > { %774 = vmatprep.subr.bf16.mxu0 (!%p722_p8), %v905_v41 }
  0x3a   : > { %775 = vmatpush3.bf16.msra.mxu0 (!%p722_p8), %v849_v46 }
  0x3b   : > { %776 = vmatprep.subr.bf16.mxu0 (!%p722_p8), %v905_v41 }
  0x3e   : > { %777 = vmatpush3.bf16.msra.mxu0 (!%p722_p8), %v850_v47 }
  0x3f   : > { %778 = vmatprep.subr.bf16.mxu0 (!%p722_p8), %v905_v41 }
  0x42   : > { %779 = vmatpush3.bf16.msra.mxu0 (!%p722_p8), %v851_v48 }
  0x43   : > { %780 = vmatprep.subr.bf16.mxu0 (!%p722_p8), %v905_v41 }
  0x46   : > { %781 = vmatpush3.bf16.msra.mxu0 (!%p722_p8), %v852_v49 }
  0xfc   : > { %v378_v6 = vpop.f32.mrb[0].mxu0 }
  0xfd   : > { %v756_v7 = vpop.f32.mrb[1].mxu0  ;;  %v386_v8 = vsel %vm385_vm2, %v378_v6, -inf }
  0xfe   : > { %387 = vmax.xlane.f32.xlu0 %v386_v8  ;;  %v381_v9 = vpop.f32.mrb[2].mxu0 }
  0xff   : > { %v757_v10 = vpop.f32.mrb[3].mxu0 }
 0x18b   : > { %v388_v13 = vpop.xlane.xlu0 %387 }
 0x18c   : > { %v389_v14 = vmax.f32 %v384_v12, %v388_v13 }
 0x18e   : > { %v390_v15 = vsub.f32 %v384_v12, %v389_v14  ;;  %474 = vst.msk [vmem:[#allocation2] sm:$0xff] %vm407_vm3, %v389_v14  ;;  %395 = vperm.xlu0 %834, %v389_v14  }
 0x190   : > { %v391_v24 = vmul.f32 1.442695, %v390_v15 }
 0x192   : > { %844 = vset.pattern.permute.xlu0 (!%p722_p8), %v904_v40 }
 0x20d   : > { %v396_v18 = vpop.permute.xlu0 %395 }
 0x20e   : > { %v398_v19 = vsub.f32 %v378_v6, %v396_v18 }
 0x210   : > { %v399_v20 = vmul.f32 1.442695, %v398_v19 }
 0x212   : > { %840 = vpow2.f32 %v399_v20 }
 0x213   : > { %842 = vpow2.f32 %v391_v24 }
 0x21c   : > { %v841_v21 = vpop.eup %840 }
 0x21d   : > { %v403_v22 = vsel %vm385_vm2, %v841_v21, 0.0  ;;  %v416_v23 = vpack.c.bf16 %v841_v21, %v841_v21  ;;  %v843_v25 = vpop.eup %842 }
 0x21e   : > { %404 = vadd.xlane.f32.xlu1 %v403_v22  ;;  %v402_v27 = vmul.f32 %v843_v25, %v401_v26 }
 0x21f   : > { %763 = vmatmul.mubr.msk.bf16.vlgmr.msra.gmra.mrb[0].mxu1 %vm385_vm2, %v416_v23 }
 0x22f   : > { %412 = vperm.xlu1 %835, %v843_v25  }
 0x2ab   : > { %v405_v28 = vpop.xlane.xlu1 %404 }
 0x2ac   : > { %v406_v29 = vadd.f32 %v405_v28, %v402_v27 }
 0x2ae   : > { %408 = vst.msk [vmem:[#allocation3] sm:$0xff] %vm407_vm3, %v406_v29 }
 0x2af   : > { %v413_v31 = vpop.permute.xlu1 %412 }
 0x2b0   : > { %v415_v32 = vmul.f32 %v413_v31, %v409_v30 }
 0x2b5   : > { %v480_v38 = vld [vmem:[#allocation3] sm:$0xff] (!%p722_p8) }
 0x2b6   : > { %853 = vrcp.f32 (!%p722_p8), %v480_v38 }
 0x2c0   : > { %v854_v45 = vpop.eup (!%p722_p8), %853 }
 0x2c1   : > { %484 = vperm.xlu0 (!%p722_p8), %844, %v854_v45  }
 0x2ef   : > { %478 = sbr.rel (%p722_p8) target bundleno = 1079 (0x437), region = 52 }
 0x2f2   : > { %v466_v33 = vpop.f32.mrb[0].mxu1 }
 0x2f3   : > { %v472_v34 = vadd.f32 %v466_v33, %v415_v32  ;;  %v764_v35 = vpop.f32.mrb[1].mxu1 }
 0x2f4   : > { %v469_v36 = vpop.f32.mrb[2].mxu1 }
 0x2f5   : > { %473 = vst [vmem:[#allocation4] sm:$0xff] %v472_v34  ;;  %v765_v37 = vpop.f32.mrb[3].mxu1 }
 0x2fc   : > { %v479_v50 = vld [vmem:[#allocation4] sm:$0xff] }
 0x340   : > { %v485_v51 = vpop.permute.xlu0 %484 }
 0x341   : > { %v487_v52 = vmul.f32 %v485_v51, %v479_v50 }
 0x343   : > { %v488_v53 = vpack.c.bf16 %v487_v52, %v487_v52 }
 0x345   : > { %783 = vmatmul.mubr.bf16.vlgmr.msra.gmra.mrb[0].mxu0 %v488_v53 }
 0x418   : > { %v594_v55 = vpop.f32.mrb[0].mxu0 }
 0x419   : > { %v595_v56 = vadd.f32 %v723_v54, %v594_v55  ;;  %v784_v57 = vpop.f32.mrb[1].mxu0 }
 0x41a   : > { %v597_v58 = vpop.f32.mrb[2].mxu0 }
 0x41b   : > { %v732_v59 = vmul.f32 -1.442695, %v595_v56  ;;  %v785_v60 = vpop.f32.mrb[3].mxu0 }
 0x41d   : > { %855 = vpow2.f32 %v732_v59 }
 0x427   : > { %v856_v0 = vpop.eup %855 }
 0x428   : > { %v605_v1 = vadd.f32 1.0, %v856_v0 }
 0x42a   : > { %857 = vrcp.f32 %v605_v1 }
 0x434   : > { %v858_v5 = vpop.eup %857 }
 0x435   : > { %v614_v6 = vsel %vm613_vm6, %v858_v5, %v595_v56 }
 0x436   : > { %615 = vst [vmem:[%s978_s9] sm:$0xff] %v614_v6 }
 0x437 PF: > { %s16_s25 = sadd.s32 1, %s897_s25   ;;  %s1053_s21 = smov %s889_s23 }
 0x438   : > { %p13_p9 = scmp.ge.s32.totalorder %s16_s25, 6   ;;  %s1054_s22 = smov %s893_s24 }
 0x439   : > { %s1055_s23 = smov %s1058_s26  ;;  %s1056_s24 = smov %s1062_s27 }
 0x43a   :  { %15 = sbr.rel (!%p13_p9) target bundleno = 3 (0x3), region = 85 }

// kernel: rtdetr_forward.3
= control target key start
LH: loop header
LB: loop body
LE: loop exit
PB: predicated region body
PF: predicated region fallthrough
CT: control target
= control target key end

     0   :  { %s1530_s13 = smov 0   ;;  %s1681_s0 = inlined_call_operand.vmem [shape: bf16[128,128], index: 0, kind: input, shape index: {}]   ;;  %s1682_s1 = inlined_call_operand.vmem [shape: bf16[128,128], index: 1, kind: input, shape index: {}]   ;;  %s1683_s2 = inlined_call_operand.vmem [shape: f32[1,128], index: 2, kind: input, shape index: {}]   ;;  %s1684_s3 = inlined_call_operand.vmem [shape: bf16[128,128], index: 3, kind: input, shape index: {}]   ;;  %s1685_s4 = inlined_call_operand.vmem [shape: f32[1,128], index: 4, kind: input, shape index: {}]   ;;  %s1686_s5 = inlined_call_operand.vmem [shape: bf16[128,128], index: 5, kind: input, shape index: {}]   ;;  %s1687_s6 = inlined_call_operand.vmem [shape: f32[1,128], index: 6, kind: input, shape index: {}]   ;;  %s1688_s7 = inlined_call_operand.vmem [shape: bf16[128,128], index: 7, kind: input, shape index: {}]   ;;  %s1689_s8 = inlined_call_operand.vmem [shape: f32[1,128], index: 8, kind: input, shape index: {}]   ;;  %s1690_s9 = inlined_call_operand.vmem [shape: bf16[128,128], index: 9, kind: output, shape index: {0}]   ;;  %s1691_s10 = inlined_call_operand.vmem [shape: bf16[128,128], index: 10, kind: output, shape index: {1}]  }
   0x1 LB: > { %s1148_s14 = sadd.s32 4294967295, %s1473_s13   ;;  %p1152_p0 = scmp.ge.s32.totalorder %s1473_s13, 1  ;;  %s1473_s13 = sphi %s1530_s13, %s21_s13  }
   0x2   : > { %p316_p1 = scmp.lt.s32.totalorder %s1473_s13, 3 }
   0x4   : > { %p317_p2 = pnand %p1152_p0, %p316_p1 }
   0x5   : > { %v1431_v0 = vld [vmem:[%s1682_s1] sm:$0xff] (!%p317_p2)   ;;  %s1153_s17 = sshll.u32 (!%p317_p2), %s1148_s14, 3  ;;  %v1432_v1 = vld [vmem:[%s1682_s1 + $0x8] sm:$0xff] (!%p317_p2)   ;;  %v1433_v2 = vld [vmem:[%s1682_s1 + $0x10] sm:$0xff] (!%p317_p2)  }
   0x6   : > { %320 = sbr.rel (%p317_p2) target bundleno = 710 (0x2c6), region = 56  ;;  %p360_p3 = scmp.lt.s32.totalorder (!%p317_p2), %s1153_s17, 15  ;;  %1327 = vmatprep.subr.bf16.mxu0 (!%p317_p2), %v1431_v0  ;;  %v1434_v3 = vld [vmem:[%s1682_s1 + $0x18] sm:$0xff] (!%p317_p2)   ;;  %v1435_v5 = vld [vmem:[%s1682_s1 + $0x20] sm:$0xff] (!%p317_p2)   ;;  %v1444_v7 = vld [vmem:[%s1684_s3 + $0x8] sm:$0xff] (!%p317_p2)  }
   0x7   : > { %1328 = vmatpush3.bf16.msra.mxu0 (!%p317_p2), %v1431_v0  ;;  %v1443_v6 = vld [vmem:[%s1684_s3] sm:$0xff] (!%p317_p2)   ;;  %v1436_v8 = vld [vmem:[%s1682_s1 + $0x28] sm:$0xff] (!%p317_p2)   ;;  %v1445_v9 = vld [vmem:[%s1684_s3 + $0x10] sm:$0xff] (!%p317_p2)  }
   0x8   : > { %1329 = vmatprep.subr.bf16.mxu0 (!%p317_p2), %v1432_v1  ;;  %1351 = vmatprep.subr.bf16.mxu1 (!%p317_p2), %v1443_v6  ;;  %v1437_v10 = vld [vmem:[%s1682_s1 + $0x30] sm:$0xff] (!%p317_p2)   ;;  %v1446_v11 = vld [vmem:[%s1684_s3 + $0x18] sm:$0xff] (!%p317_p2)   ;;  %v1447_v13 = vld [vmem:[%s1684_s3 + $0x20] sm:$0xff] (!%p317_p2)  }
   0x9   : > { %1352 = vmatpush3.bf16.msra.mxu1 (!%p317_p2), %v1443_v6  ;;  %v1438_v12 = vld [vmem:[%s1682_s1 + $0x38] sm:$0xff] (!%p317_p2)   ;;  %v1448_v14 = vld [vmem:[%s1684_s3 + $0x28] sm:$0xff] (!%p317_p2)   ;;  %v1449_v18 = vld [vmem:[%s1684_s3 + $0x30] sm:$0xff] (!%p317_p2)  }
   0xa   : > { %1353 = vmatprep.subr.bf16.mxu1 (!%p317_p2), %v1444_v7  ;;  %v1450_v19 = vld [vmem:[%s1684_s3 + $0x38] sm:$0xff] (!%p317_p2)   ;;  %v1451_v20 = vld [vmem:[%s1686_s5] sm:$0xff] (!%p317_p2)   ;;  %v1453_v22 = vld [vmem:[%s1686_s5 + $0x8] sm:$0xff] (!%p317_p2)  }
   0xb   : > { %1330 = vmatpush3.bf16.msra.mxu0 (!%p317_p2), %v1432_v1  ;;  %v1452_v21 = vld [vmem:[%s1688_s7] sm:$0xff] (!%p317_p2)   ;;  %v1455_v23 = vld [vmem:[%s1686_s5 + $0x10] sm:$0xff] (!%p317_p2)   ;;  %v1457_v24 = vld [vmem:[%s1686_s5 + $0x18] sm:$0xff] (!%p317_p2)  }
   0xc   : > { %1331 = vmatprep.subr.bf16.mxu0 (!%p317_p2), %v1433_v2  ;;  %v1459_v25 = vld [vmem:[%s1686_s5 + $0x20] sm:$0xff] (!%p317_p2)   ;;  %v1461_v26 = vld [vmem:[%s1686_s5 + $0x28] sm:$0xff] (!%p317_p2)   ;;  %v1456_v53 = vld [vmem:[%s1688_s7 + $0x10] sm:$0xff] (!%p317_p2)  }
   0xd   : > { %s1693_s17 = smov (!%p360_p3, %s1153_s17), 15  ;;  %1354 = vmatpush3.bf16.msra.mxu1 %v1444_v7  ;;  %v1159_v27 = vld [vmem:[%s1683_s2] ss:$0 sm:$0xff]  ;;  %v1454_v45 = vld [vmem:[%s1688_s7 + $0x8] sm:$0xff]   ;;  %v1458_v58 = vld [vmem:[%s1688_s7 + $0x18] sm:$0xff]  }
   0xe   : > { %s1547_s22 = sshll.u32 %s1693_s17, 2  ;;  %1355 = vmatprep.subr.bf16.mxu1 %v1445_v9  ;;  %v1460_v59 = vld [vmem:[%s1688_s7 + $0x20] sm:$0xff]   ;;  %v1462_v60 = vld [vmem:[%s1688_s7 + $0x28] sm:$0xff]   ;;  %v1463_v61 = vld [vmem:[%s1686_s5 + $0x30] sm:$0xff]  }
   0xf   : > { %s1553_s25 = scalar_lea.vmem %s1681_s0, %s1547_s22  ;;  %1332 = vmatpush3.bf16.msra.mxu0 %v1433_v2  ;;  %v1464_v62 = vld [vmem:[%s1688_s7 + $0x30] sm:$0xff]   ;;  %v1465_v63 = vld [vmem:[%s1686_s5 + $0x38] sm:$0xff]   ;;  %v1172_v1 = vld [vmem:[%s1685_s4] ss:$0 sm:$0xff]  ;;  %s1662_s21 = scalar_lea.vmem %s1690_s9, %s1547_s22 }
  0x10   : > { %v1439_v4 = vld [vmem:[%s1553_s25] sm:$0xff]   ;;  %1333 = vmatprep.subr.bf16.mxu0 %v1434_v3  ;;  %v1440_v15 = vld [vmem:[%s1553_s25 + $0x8] sm:$0xff]   ;;  %v1441_v16 = vld [vmem:[%s1553_s25 + $0x10] sm:$0xff]   ;;  %s1668_s26 = scalar_lea.vmem %s1691_s10, %s1547_s22 }
  0x11   : > { %1343 = vmatprep.mubr.bf16.mxu0 %v1439_v4  ;;  %1356 = vmatpush3.bf16.msra.mxu1 %v1445_v9  ;;  %v1442_v17 = vld [vmem:[%s1553_s25 + $0x18] sm:$0xff]  }
  0x12   : > { %1357 = vmatprep.subr.bf16.mxu1 %v1446_v11  ;;  %v1466_v0 = vld [vmem:[%s1688_s7 + $0x38] sm:$0xff]  }
  0x13   : > { %1334 = vmatpush3.bf16.msra.mxu0 %v1434_v3 }
  0x14   : > { %1335 = vmatprep.subr.bf16.mxu0 %v1435_v5 }
  0x15   : > { %1358 = vmatpush3.bf16.msra.mxu1 %v1446_v11 }
  0x16   : > { %1359 = vmatprep.subr.bf16.mxu1 %v1447_v13 }
  0x17   : > { %1336 = vmatpush3.bf16.msra.mxu0 %v1435_v5 }
  0x18   : > { %1337 = vmatprep.subr.bf16.mxu0 %v1436_v8 }
  0x19   : > { %1360 = vmatpush3.bf16.msra.mxu1 %v1447_v13 }
  0x1a   : > { %1361 = vmatprep.subr.bf16.mxu1 %v1448_v14 }
  0x1b   : > { %1338 = vmatpush3.bf16.msra.mxu0 %v1436_v8 }
  0x1c   : > { %1339 = vmatprep.subr.bf16.mxu0 %v1437_v10 }
  0x1d   : > { %1362 = vmatpush3.bf16.msra.mxu1 %v1448_v14 }
  0x1e   : > { %1363 = vmatprep.subr.bf16.mxu1 %v1449_v18 }
  0x1f   : > { %1340 = vmatpush3.bf16.msra.mxu0 %v1437_v10 }
  0x20   : > { %1341 = vmatprep.subr.bf16.mxu0 %v1438_v12 }
  0x21   : > { %1364 = vmatpush3.bf16.msra.mxu1 %v1449_v18 }
  0x22   : > { %1365 = vmatprep.subr.bf16.mxu1 %v1450_v19 }
  0x23   : > { %1342 = vmatpush3.bf16.msra.mxu0 %v1438_v12 }
  0x24   : > { %1375 = vmatprep.subr.bf16.mxu0 %v1451_v20 }
  0x25   : > { %1366 = vmatpush3.bf16.msra.mxu1 %v1450_v19 }
  0x26   : > { %1344 = vmatmul.mubr.bf16.vlgmr.msra.gmra.mrb[0].mxu0 %v1440_v15  ;;  %1399 = vmatprep.subr.bf16.mxu1 %v1452_v21 }
  0x27   : > { %1347 = vmatprep.mubr.bf16.mxu0 %v1441_v16  ;;  %1376 = vmatpush3.bf16.msra.mxu0 %v1451_v20 }
  0x28   : > { %1377 = vmatprep.subr.bf16.mxu0 %v1453_v22 }
  0x2b   : > { %1378 = vmatpush3.bf16.msra.mxu0 %v1453_v22 }
  0x2c   : > { %1379 = vmatprep.subr.bf16.mxu0 %v1455_v23 }
  0x2e   : > { %1348 = vmatmul.mubr.bf16.gmra.mrb[4].mxu0 %v1442_v17 }
  0x2f   : > { %1380 = vmatpush3.bf16.msra.mxu0 %v1455_v23 }
  0x30   : > { %1381 = vmatprep.subr.bf16.mxu0 %v1457_v24 }
  0x33   : > { %1382 = vmatpush3.bf16.msra.mxu0 %v1457_v24 }
  0x34   : > { %1383 = vmatprep.subr.bf16.mxu0 %v1459_v25 }
  0x37   : > { %1384 = vmatpush3.bf16.msra.mxu0 %v1459_v25 }
  0x38   : > { %1385 = vmatprep.subr.bf16.mxu0 %v1461_v26 }
  0x3b   : > { %1386 = vmatpush3.bf16.msra.mxu0 %v1461_v26 }
  0x3c   : > { %1387 = vmatprep.subr.bf16.mxu0 %v1463_v61 }
  0x3f   : > { %1388 = vmatpush3.bf16.msra.mxu0 %v1463_v61 }
  0x40   : > { %1389 = vmatprep.subr.bf16.mxu0 %v1465_v63 }
  0x43   : > { %1390 = vmatpush3.bf16.msra.mxu0 %v1465_v63 }
  0xf9   : > { %v1345_v28 = vpop.f32.mrb[0].mxu0 }
  0xfa   : > { %v524_v29 = vadd.f32 %v1345_v28, %v1159_v27  ;;  %v515_v30 = vpop.f32.mrb[1].mxu0 }
  0xfb   : > { %v516_v31 = vadd.f32 %v1159_v27, %v515_v30  ;;  %v1346_v32 = vpop.f32.mrb[2].mxu0 }
  0xfc   : > { %v527_v33 = vadd.f32 %v1346_v32, %v1159_v27  ;;  %v518_v34 = vpop.f32.mrb[3].mxu0  ;;  %v548_v36 = vmax.f32 %v524_v29, 0.0 }
  0xfd   : > { %v519_v35 = vadd.f32 %v1159_v27, %v518_v34  ;;  %v546_v38 = vmax.f32 %v516_v31, 0.0  ;;  %v1181_v31 = vld [vmem:[%s1687_s6] ss:$0 sm:$0xff] }
  0xfe   : > { %v549_v37 = vmax.f32 %v527_v33, 0.0  ;;  %v1190_v33 = vld [vmem:[%s1689_s8] ss:$0 sm:$0xff] }
  0xff   : > { %v547_v39 = vmax.f32 %v519_v35, 0.0 }
 0x100   : > { %v555_v40 = vpack.c.bf16 %v549_v37, %v548_v36 }
 0x101   : > { %v1349_v41 = vpop.f32.mrb[4].mxu0  ;;  %v554_v42 = vpack.c.bf16 %v547_v39, %v546_v38 }
 0x102   : > { %v540_v43 = vadd.f32 %v1349_v41, %v1159_v27  ;;  %v531_v44 = vpop.f32.mrb[5].mxu0 }
 0x103   : > { %v532_v46 = vadd.f32 %v1159_v27, %v531_v44  ;;  %v1350_v47 = vpop.f32.mrb[6].mxu0  ;;  %1367 = vmatprep.mubr.bf16.mxu1 %v554_v42 }
 0x104   : > { %v543_v48 = vadd.f32 %v1350_v47, %v1159_v27  ;;  %v534_v49 = vpop.f32.mrb[7].mxu0  ;;  %1368 = vmatmul.mubr.bf16.vlgmr.msra.gmra.mrb[0].mxu1 %v555_v40  ;;  %v552_v51 = vmax.f32 %v540_v43, 0.0 }
 0x105   : > { %v535_v50 = vadd.f32 %v1159_v27, %v534_v49  ;;  %1400 = vmatpush3.bf16.msra.mxu1 %v1452_v21  ;;  %v550_v54 = vmax.f32 %v532_v46, 0.0 }
 0x106   : > { %v553_v52 = vmax.f32 %v543_v48, 0.0  ;;  %1401 = vmatprep.subr.bf16.mxu1 %v1454_v45 }
 0x107   : > { %v551_v55 = vmax.f32 %v535_v50, 0.0 }
 0x108   : > { %v557_v56 = vpack.c.bf16 %v553_v52, %v552_v51 }
 0x109   : > { %v556_v57 = vpack.c.bf16 %v551_v55, %v550_v54  ;;  %1402 = vmatpush3.bf16.msra.mxu1 %v1454_v45 }
 0x10a   : > { %1403 = vmatprep.subr.bf16.mxu1 %v1456_v53 }
 0x10b   : > { %1371 = vmatprep.mubr.bf16.mxu1 %v556_v57 }
 0x10c   : > { %1372 = vmatmul.mubr.bf16.gmra.mrb[4].mxu1 %v557_v56 }
 0x10d   : > { %1404 = vmatpush3.bf16.msra.mxu1 %v1456_v53 }
 0x10e   : > { %1405 = vmatprep.subr.bf16.mxu1 %v1458_v58 }
 0x111   : > { %1406 = vmatpush3.bf16.msra.mxu1 %v1458_v58 }
 0x112   : > { %1407 = vmatprep.subr.bf16.mxu1 %v1460_v59 }
 0x115   : > { %1408 = vmatpush3.bf16.msra.mxu1 %v1460_v59 }
 0x116   : > { %1409 = vmatprep.subr.bf16.mxu1 %v1462_v60 }
 0x119   : > { %1410 = vmatpush3.bf16.msra.mxu1 %v1462_v60 }
 0x11a   : > { %1411 = vmatprep.subr.bf16.mxu1 %v1464_v62 }
 0x11d   : > { %1412 = vmatpush3.bf16.msra.mxu1 %v1464_v62 }
 0x11e   : > { %1413 = vmatprep.subr.bf16.mxu1 %v1466_v0 }
 0x121   : > { %1414 = vmatpush3.bf16.msra.mxu1 %v1466_v0 }
 0x1d7   : > { %v1369_v2 = vpop.f32.mrb[0].mxu1 }
 0x1d8   : > { %v672_v3 = vadd.f32 %v1369_v2, %v1172_v1  ;;  %v663_v4 = vpop.f32.mrb[1].mxu1 }
 0x1d9   : > { %v664_v5 = vadd.f32 %v1172_v1, %v663_v4  ;;  %v1370_v6 = vpop.f32.mrb[2].mxu1 }
 0x1da   : > { %v675_v7 = vadd.f32 %v1370_v6, %v1172_v1  ;;  %v666_v8 = vpop.f32.mrb[3].mxu1  ;;  %v696_v10 = vmax.f32 %v672_v3, 0.0 }
 0x1db   : > { %v667_v9 = vadd.f32 %v1172_v1, %v666_v8  ;;  %v694_v12 = vmax.f32 %v664_v5, 0.0 }
 0x1dc   : > { %v697_v11 = vmax.f32 %v675_v7, 0.0 }
 0x1dd   : > { %v695_v13 = vmax.f32 %v667_v9, 0.0 }
 0x1de   : > { %v703_v14 = vpack.c.bf16 %v697_v11, %v696_v10 }
 0x1df   : > { %v702_v15 = vpack.c.bf16 %v695_v13, %v694_v12  ;;  %v1373_v16 = vpop.f32.mrb[4].mxu1 }
 0x1e0   : > { %v688_v17 = vadd.f32 %v1373_v16, %v1172_v1  ;;  %v679_v18 = vpop.f32.mrb[5].mxu1 }
 0x1e1   : > { %v680_v19 = vadd.f32 %v1172_v1, %v679_v18  ;;  %v1374_v20 = vpop.f32.mrb[6].mxu1  ;;  %1391 = vmatprep.mubr.bf16.mxu0 %v702_v15  ;;  %1415 = vmatprep.mubr.bf16.mxu1 %v702_v15 }
 0x1e2   : > { %v691_v21 = vadd.f32 %v1374_v20, %v1172_v1  ;;  %v682_v22 = vpop.f32.mrb[7].mxu1  ;;  %1392 = vmatmul.mubr.bf16.vlgmr.msra.gmra.mrb[8].mxu0 %v703_v14  ;;  %1416 = vmatmul.mubr.bf16.vlgmr.msra.gmra.mrb[8].mxu1 %v703_v14  ;;  %v700_v24 = vmax.f32 %v688_v17, 0.0 }
 0x1e3   : > { %v683_v23 = vadd.f32 %v1172_v1, %v682_v22  ;;  %v698_v26 = vmax.f32 %v680_v19, 0.0 }
 0x1e4   : > { %v701_v25 = vmax.f32 %v691_v21, 0.0 }
 0x1e5   : > { %v699_v27 = vmax.f32 %v683_v23, 0.0 }
 0x1e6   : > { %v705_v28 = vpack.c.bf16 %v701_v25, %v700_v24 }
 0x1e7   : > { %v704_v29 = vpack.c.bf16 %v699_v27, %v698_v26 }
 0x1e9   : > { %1395 = vmatprep.mubr.bf16.mxu0 %v704_v29  ;;  %1419 = vmatprep.mubr.bf16.mxu1 %v704_v29 }
 0x1ea   : > { %1396 = vmatmul.mubr.bf16.gmra.mrb[12].mxu0 %v705_v28  ;;  %1420 = vmatmul.mubr.bf16.gmra.mrb[12].mxu1 %v705_v28 }
 0x2b5   : > { %v1393_v30 = vpop.f32.mrb[8].mxu0  ;;  %v1417_v32 = vpop.f32.mrb[8].mxu1 }
 0x2b6   : > { %v811_v34 = vpop.f32.mrb[9].mxu0  ;;  %v947_v35 = vpop.f32.mrb[9].mxu1  ;;  %v820_v38 = vadd.f32 %v1393_v30, %v1181_v31  ;;  %v956_v39 = vadd.f32 %v1417_v32, %v1190_v33 }
 0x2b7   : > { %v1394_v36 = vpop.f32.mrb[10].mxu0  ;;  %v1418_v37 = vpop.f32.mrb[10].mxu1  ;;  %v812_v44 = vadd.f32 %v1181_v31, %v811_v34  ;;  %v948_v45 = vadd.f32 %v1190_v33, %v947_v35 }
 0x2b8   : > { %v823_v40 = vadd.f32 %v1394_v36, %v1181_v31  ;;  %v959_v41 = vadd.f32 %v1418_v37, %v1190_v33  ;;  %v814_v42 = vpop.f32.mrb[11].mxu0  ;;  %v950_v43 = vpop.f32.mrb[11].mxu1 }
 0x2b9   : > { %v815_v46 = vadd.f32 %v1181_v31, %v814_v42  ;;  %v951_v47 = vadd.f32 %v1190_v33, %v950_v43 }
 0x2ba   : > { %v1241_v48 = vpack.c.bf16 %v823_v40, %v820_v38  ;;  %v1261_v49 = vpack.c.bf16 %v959_v41, %v956_v39 }
 0x2bb   : > { %v1236_v50 = vpack.c.bf16 %v815_v46, %v812_v44  ;;  %v1256_v51 = vpack.c.bf16 %v951_v47, %v948_v45 }
 0x2bc   : > { %1273 = vst [vmem:[%s1662_s21 + $0x8] sm:$0xff] %v1241_v48   ;;  %1276 = vst [vmem:[%s1668_s26 + $0x8] sm:$0xff] %v1261_v49  }
 0x2bd   : > { %1237 = vst [vmem:[%s1662_s21] sm:$0xff] %v1236_v50   ;;  %1257 = vst [vmem:[%s1668_s26] sm:$0xff] %v1256_v51   ;;  %v1397_v52 = vpop.f32.mrb[12].mxu0  ;;  %v1421_v53 = vpop.f32.mrb[12].mxu1 }
 0x2be   : > { %v827_v54 = vpop.f32.mrb[13].mxu0  ;;  %v963_v55 = vpop.f32.mrb[13].mxu1  ;;  %v836_v58 = vadd.f32 %v1397_v52, %v1181_v31  ;;  %v972_v59 = vadd.f32 %v1421_v53, %v1190_v33 }
 0x2bf   : > { %v1398_v56 = vpop.f32.mrb[14].mxu0  ;;  %v1422_v57 = vpop.f32.mrb[14].mxu1  ;;  %v828_v0 = vadd.f32 %v1181_v31, %v827_v54  ;;  %v964_v1 = vadd.f32 %v1190_v33, %v963_v55 }
 0x2c0   : > { %v839_v60 = vadd.f32 %v1398_v56, %v1181_v31  ;;  %v975_v61 = vadd.f32 %v1422_v57, %v1190_v33  ;;  %v830_v62 = vpop.f32.mrb[15].mxu0  ;;  %v966_v63 = vpop.f32.mrb[15].mxu1 }
 0x2c1   : > { %v831_v2 = vadd.f32 %v1181_v31, %v830_v62  ;;  %v967_v3 = vadd.f32 %v1190_v33, %v966_v63 }
 0x2c2   : > { %v1251_v4 = vpack.c.bf16 %v839_v60, %v836_v58  ;;  %v1271_v5 = vpack.c.bf16 %v975_v61, %v972_v59 }
 0x2c3   : > { %v1246_v6 = vpack.c.bf16 %v831_v2, %v828_v0  ;;  %v1266_v7 = vpack.c.bf16 %v967_v3, %v964_v1 }
 0x2c4   : > { %1275 = vst [vmem:[%s1662_s21 + $0x18] sm:$0xff] %v1251_v4   ;;  %1278 = vst [vmem:[%s1668_s26 + $0x18] sm:$0xff] %v1271_v5  }
 0x2c5   : > { %1274 = vst [vmem:[%s1662_s21 + $0x10] sm:$0xff] %v1246_v6   ;;  %1277 = vst [vmem:[%s1668_s26 + $0x10] sm:$0xff] %v1266_v7  }
 0x2c6 PF: > { %s21_s13 = sadd.s32 1, %s1473_s13  }
 0x2c7   : > { %p18_p4 = scmp.ge.s32.totalorder %s21_s13, 4  }
 0x2c9   :  { %20 = sbr.rel (!%p18_p4) target bundleno = 1 (0x1), region = 98 }

</bundles_post_ra>
